<compile_context>
chip_gen: v7x
topology: tpu7x:2x2x1
jax: 0.10.0
libtpu: 0.0.40
codegen_flags: <defaults>
</compile_context>

<pallas_src>
import functools
import math

import jax
import jax.numpy as jnp
from jax.experimental import pallas as pl
from jax.experimental.pallas import tpu as pltpu


# ----------------------------- kernel ---------------------------------------

def _fused_loss_kernel(seg_ref, tgt_ref, fin_ref, ftg_ref,
                       lbl_ref, lbl_tgt_ref, bb_in_ref, bb_tg_ref,
                       out_ref, *, n_cls, lbl_n, lbl_c):
    """Per-tile partial sums for all four losses.

    seg_ref    : (1, C, TR, 128)  seg logits (NCHW-native, spatial on lanes)
    tgt_ref    : (1, TR, 128)     int8/int32 class ids
    fin_ref    : (1, TR, 128)     filter prediction
    ftg_ref    : (1, TR, 128)     filter target
    lbl_ref    : (N, C_lbl)       label logits (VMEM-resident, used at (0,0))
    lbl_tgt_ref: (N, 1) int32     label targets
    bb_in_ref  : (N, 4)           bbox prediction
    bb_tg_ref  : (N, 4)           bbox target
    out_ref    : (1, 1, 8, 128)   sublane 0: CE partial sums, sublane 1: L1
                                  partial sums; sublanes 2/3 (block (0,0)
                                  only): labels mean-CE, bbox mean-MSE.
    """
    tgt = tgt_ref[0].astype(jnp.int32)                        # (TR, 128)

    # --- segmentation CE: unrolled per-class reduction, (TR,128) temps only.
    m = seg_ref[0, 0].astype(jnp.float32)
    for cc in range(1, n_cls):
        m = jnp.maximum(m, seg_ref[0, cc].astype(jnp.float32))

    esum = jnp.zeros_like(m)
    picked = jnp.zeros_like(m)
    for cc in range(n_cls):
        lc = seg_ref[0, cc].astype(jnp.float32)
        esum = esum + jnp.exp(lc - m)
        picked = picked + jnp.where(tgt == cc, lc, 0.0)

    ce = m + jnp.log(esum) - picked                           # (TR, 128)

    # --- filter L1 on the same spatial walk (shared DMA pipeline).
    l1 = jnp.abs(fin_ref[0].astype(jnp.float32)
                 - ftg_ref[0].astype(jnp.float32))

    ce_lane = jnp.sum(ce, axis=0, keepdims=True)              # (1, 128)
    l1_lane = jnp.sum(l1, axis=0, keepdims=True)              # (1, 128)

    row8 = jax.lax.broadcasted_iota(jnp.int32, (8, 128), 0)
    out_ref[0, 0] = jnp.where(row8 == 0, ce_lane,
                              jnp.where(row8 == 1, l1_lane, 0.0))

    # --- labels CE + bbox MSE: a few hundred bytes of work, folded into the
    #     first grid point instead of a dedicated pallas_call.
    @pl.when((pl.program_id(0) == 0) & (pl.program_id(1) == 0))
    def _():
        logits = lbl_ref[...].astype(jnp.float32)             # (N, C_lbl)
        t = lbl_tgt_ref[...]                                  # (N, 1) int32
        rmax = jnp.max(logits, axis=-1, keepdims=True)
        lse = rmax + jnp.log(jnp.sum(jnp.exp(logits - rmax), axis=-1,
                                     keepdims=True))
        col = jax.lax.broadcasted_iota(jnp.int32, (lbl_n, lbl_c), 1)
        pick = jnp.sum(jnp.where(col == t, logits, 0.0), axis=-1,
                       keepdims=True)
        labels_ce = jnp.sum(lse - pick) * (1.0 / lbl_n)

        db = (bb_in_ref[...].astype(jnp.float32)
              - bb_tg_ref[...].astype(jnp.float32))
        bbox_mse = jnp.sum(db * db) * (1.0 / db.size)

        out_ref[0, 0] = jnp.where(row8 == 0, ce_lane,
                        jnp.where(row8 == 1, l1_lane,
                        jnp.where(row8 == 2, labels_ce,
                        jnp.where(row8 == 3, bbox_mse, 0.0))))


# ----------------------------- tiling ---------------------------------------

def _round_down(x, m):
    return (x // m) * m


def _choose_tile_rows(s_rows, n_cls, seg_bytes, fil_bytes,
                      max_tile_rows, vmem_budget_bytes):
    """Pick (tile_rows, num_tiles, padded_rows) for the 128-lane spatial rows.

    Prefers shapes that need NO JAX-side padding:
      * single tile covering all rows (block == full dim, any row count), or
      * a multiple-of-8 divisor of the row count.
    Falls back to zero-padding (corrected exactly in the wrapper) otherwise.
    """
    # Per-row VMEM bytes: double-buffered inputs (C seg planes + int32 targets
    # + two filter planes) plus ~8 live f32 temporary planes in the body.
    per_row = (2 * (n_cls * seg_bytes + 4 + 2 * fil_bytes) + 8 * 4) * 128
    cap = min(int(max_tile_rows), max(8, int(vmem_budget_bytes // per_row)))
    cap = max(8, _round_down(cap, 8))

    if s_rows <= cap:
        return s_rows, 1, 0                 # single tile, no padding

    for tr in range(cap, 7, -8):            # largest mult-of-8 divisor <= cap
        if s_rows % tr == 0:
            if tr >= max(8, cap // 8):
                return tr, s_rows // tr, 0
            break

    g = -(-s_rows // cap)                   # fallback: pad rows up to g*cap
    return cap, g, g * cap - s_rows


# ----------------------------- wrapper ---------------------------------------

def _fused_losses(input_labels, target_labels, input_bboxes, target_bboxes,
                  seg_logits, seg_targets, filt_in, filt_tg,
                  *, max_tile_rows=1024, vmem_budget_bytes=10 << 20):
    n, c, h, w = seg_logits.shape
    s = h * w
    s_rows = pl.cdiv(s, 128)
    seg_bytes = jnp.dtype(seg_logits.dtype).itemsize
    fil_bytes = jnp.dtype(filt_in.dtype).itemsize

    tr, g, _pad_rows = _choose_tile_rows(s_rows, c, seg_bytes, fil_bytes,
                                         max_tile_rows, vmem_budget_bytes)
    s_rows_pad = g * tr
    s_pad = s_rows_pad * 128
    pad_elems = s_pad - s                   # per batch sample, >= 0

    seg = seg_logits.reshape(n, c, s)       # contiguous, no copy
    tgt2 = seg_targets.reshape(n, s)
    fin2 = filt_in.reshape(n, s)
    ftg2 = filt_tg.reshape(n, s)
    if pad_elems:
        # Rare fallback (costs one extra HBM copy of each stream).  Zero pads
        # contribute exactly log(C) per padded pixel to the CE sum and 0 to
        # the L1 sum; corrected exactly below -> no in-kernel mask needed.
        seg = jnp.pad(seg, ((0, 0), (0, 0), (0, pad_elems)))
        tgt2 = jnp.pad(tgt2, ((0, 0), (0, pad_elems)))
        fin2 = jnp.pad(fin2, ((0, 0), (0, pad_elems)))
        ftg2 = jnp.pad(ftg2, ((0, 0), (0, pad_elems)))

    seg = seg.reshape(n, c, s_rows_pad, 128)
    use_i8 = (c <= 127) and (tr % 32 == 0)
    tgt_dtype = jnp.int8 if use_i8 else jnp.int32
    tgt = tgt2.astype(tgt_dtype).reshape(n, s_rows_pad, 128)
    fin = fin2.reshape(n, s_rows_pad, 128)
    ftg = ftg2.reshape(n, s_rows_pad, 128)

    n_lbl, c_lbl = input_labels.shape
    lbl_tgt = target_labels.reshape(n_lbl, 1).astype(jnp.int32)

    kernel = functools.partial(_fused_loss_kernel, n_cls=c,
                               lbl_n=n_lbl, lbl_c=c_lbl)
    partials = pl.pallas_call(
        kernel,
        out_shape=jax.ShapeDtypeStruct((n, g, 8, 128), jnp.float32),
        grid=(n, g),
        in_specs=[
            pl.BlockSpec((1, c, tr, 128), lambda i, j: (i, 0, j, 0)),
            pl.BlockSpec((1, tr, 128), lambda i, j: (i, j, 0)),
            pl.BlockSpec((1, tr, 128), lambda i, j: (i, j, 0)),
            pl.BlockSpec((1, tr, 128), lambda i, j: (i, j, 0)),
            # small, VMEM-resident side inputs (constant block index)
            pl.BlockSpec((n_lbl, c_lbl), lambda i, j: (0, 0)),
            pl.BlockSpec((n_lbl, 1), lambda i, j: (0, 0)),
            pl.BlockSpec(input_bboxes.shape, lambda i, j: (0, 0)),
            pl.BlockSpec(target_bboxes.shape, lambda i, j: (0, 0)),
        ],
        out_specs=pl.BlockSpec((1, 1, 8, 128), lambda i, j: (i, j, 0, 0)),
        compiler_params=pltpu.CompilerParams(
            dimension_semantics=("parallel", "parallel")),
    )(seg, tgt, fin, ftg, input_labels, lbl_tgt, input_bboxes, target_bboxes)

    inv_count = 1.0 / float(n * s)          # exact static denominator
    ce_sum = jnp.sum(partials[:, :, 0, :])
    if pad_elems:
        ce_sum = ce_sum - jnp.float32(n * pad_elems * math.log(c))
    seg_ce = ce_sum * inv_count
    filt_l1 = jnp.sum(partials[:, :, 1, :]) * inv_count
    labels_ce = partials[0, 0, 2, 0]
    bbox_mse = partials[0, 0, 3, 0]
    return labels_ce, seg_ce, bbox_mse, filt_l1


def opencv_filter_loss(input_labels, input_segmentations, input_bboxes,
                       input_filters, target_labels, target_segmentations,
                       target_bboxes, target_filters,
                       flag_labels=True, flag_segmentations=True,
                       flag_bboxes=True, flag_filters=True,
                       max_tile_rows=1024, vmem_budget_bytes=10 << 20):
    """Pallas implementation of OpencvFilterLoss.forward."""
    lab, seg, bbx, fil = _fused_losses(
        input_labels, target_labels, input_bboxes, target_bboxes,
        input_segmentations, target_segmentations, input_filters,
        target_filters, max_tile_rows=max_tile_rows,
        vmem_budget_bytes=vmem_budget_bytes)

    zero = jnp.zeros((), jnp.float32)
    labels_loss = lab if flag_labels else zero
    segmentations_loss = seg if flag_segmentations else zero
    bboxes_loss = bbx if flag_bboxes else zero
    filters_loss = fil if flag_filters else zero

    labels_weight = 0.1
    segmentation_weight = 0.7
    bboxes_weights = 0.1 * 0.0001
    filters_weight = 0.1
    loss = (labels_weight * labels_loss
            + segmentation_weight * segmentations_loss
            + bboxes_weights * bboxes_loss
            + filters_weight * filters_loss)
    return loss, labels_loss, segmentations_loss, bboxes_loss, filters_loss


# ------------------------------- main ---------------------------------------

def _reference(il, iseg, ib, ifl, tl, tseg, tb, tfl):
    f32 = jnp.float32
    il, iseg, ib, ifl = il.astype(f32), iseg.astype(f32), ib.astype(f32), ifl.astype(f32)
    tb, tfl = tb.astype(f32), tfl.astype(f32)

    def ce(logits, t):
        lse = jax.nn.logsumexp(logits, axis=-1)
        picked = jnp.take_along_axis(logits, t[:, None], axis=-1)[:, 0]
        return jnp.mean(lse - picked)

    c = iseg.shape[1]
    ref_labels = ce(il, tl)
    seg2 = jnp.transpose(iseg, (0, 2, 3, 1)).reshape(-1, c)
    ref_seg = ce(seg2, tseg.reshape(-1))
    ref_mse = jnp.mean((ib - tb) ** 2)
    ref_l1 = jnp.mean(jnp.abs(ifl - tfl))
    ref_total = (0.1 * ref_labels + 0.7 * ref_seg
                 + 0.1 * 0.0001 * ref_mse + 0.1 * ref_l1)
    return ref_total, ref_labels, ref_seg, ref_mse, ref_l1


def _run_case(name, key, n, c_lbl, c_seg, h, w, dtype, max_tile_rows, tol):
    k = jax.random.split(key, 8)
    il = jax.random.normal(k[0], (n, c_lbl), jnp.float32)
    tl = jax.random.randint(k[1], (n,), 0, c_lbl, jnp.int32)
    iseg = jax.random.normal(k[2], (n, c_seg, h, w), jnp.float32).astype(dtype)
    tseg = jax.random.randint(k[3], (n, h, w), 0, c_seg, jnp.int32)
    ib = jax.random.normal(k[4], (n, 4), jnp.float32)
    tb = jax.random.normal(k[5], (n, 4), jnp.float32)
    ifl = jax.random.normal(k[6], (n, 1, h, w), jnp.float32).astype(dtype)
    tfl = jax.random.normal(k[7], (n, 1, h, w), jnp.float32).astype(dtype)

    outs = opencv_filter_loss(il, iseg, ib, ifl, tl, tseg, tb, tfl,
                              max_tile_rows=max_tile_rows)
    outs = jax.block_until_ready(outs)
    refs = _reference(il, iseg, ib, ifl, tl, tseg, tb, tfl)
    for got, want in zip(outs, refs):
        assert jnp.allclose(got, want, rtol=tol, atol=tol), (name, got, want)


if __name__ == "__main__":
    key = jax.random.PRNGKey(0)
    ks = jax.random.split(key, 3)

    # 1) base: single tile per sample (block == full spatial dim), no padding.
    _run_case("base", ks[0], n=2, c_lbl=8, c_seg=4, h=16, w=16,
              dtype=jnp.float32, max_tile_rows=1024, tol=1e-5)

    # 2) multi-tile path (divisor tiling, no pad) + int8 target stream.
    _run_case("multi_tile_int8", ks[1], n=2, c_lbl=8, c_seg=4, h=128, w=128,
              dtype=jnp.float32, max_tile_rows=32, tol=5e-4)

    # 3) fallback zero-pad path (exact log(C) correction) + bf16 inputs.
    _run_case("padded_bf16", ks[2], n=2, c_lbl=8, c_seg=4, h=48, w=48,
              dtype=jnp.bfloat16, max_tile_rows=8, tol=5e-4)

    print("KERNEL_OK")
</pallas_src>

<mosaic_0001>
module attributes {stable_mosaic.version = 11 : i64} {
  func.func @_fused_loss_kernel(%arg0: i32, %arg1: i32, %arg2: memref<1x4x2x128xf32, #tpu.memory_space<vmem>>, %arg3: memref<1x2x128xi32, #tpu.memory_space<vmem>>, %arg4: memref<1x2x128xf32, #tpu.memory_space<vmem>>, %arg5: memref<1x2x128xf32, #tpu.memory_space<vmem>>, %arg6: memref<2x8xf32, #tpu.memory_space<vmem>>, %arg7: memref<2x1xi32, #tpu.memory_space<vmem>>, %arg8: memref<2x4xf32, #tpu.memory_space<vmem>>, %arg9: memref<2x4xf32, #tpu.memory_space<vmem>>, %arg10: memref<1x1x8x128xf32, #tpu.memory_space<vmem>>) attributes {dimension_semantics = [#tpu.dimension_semantics<parallel>, #tpu.dimension_semantics<parallel>], iteration_bounds = array<i64: 2, 1>, scalar_prefetch = 0 : i64, scratch_operands = 0 : i64, tpu.core_type = #tpu.core_type<tc>, window_params = [{transform_indices = @transform_0, window_bounds = array<i64: 1, 4, 2, 128>}, {transform_indices = @transform_1, window_bounds = array<i64: 1, 2, 128>}, {transform_indices = @transform_2, window_bounds = array<i64: 1, 2, 128>}, {transform_indices = @transform_3, window_bounds = array<i64: 1, 2, 128>}, {pipeline_mode = #tpu.pipeline_mode<synchronous>, transform_indices = @transform_4, window_bounds = array<i64: 2, 8>}, {pipeline_mode = #tpu.pipeline_mode<synchronous>, transform_indices = @transform_5, window_bounds = array<i64: 2, 1>}, {pipeline_mode = #tpu.pipeline_mode<synchronous>, transform_indices = @transform_6, window_bounds = array<i64: 2, 4>}, {pipeline_mode = #tpu.pipeline_mode<synchronous>, transform_indices = @transform_7, window_bounds = array<i64: 2, 4>}, {transform_indices = @transform_8, window_bounds = array<i64: 1, 1, 8, 128>}]} {
    %c0 = arith.constant 0 : index
    %c0_0 = arith.constant 0 : index
    %c0_1 = arith.constant 0 : index
    %0 = vector.load %arg3[%c0, %c0_0, %c0_1] : memref<1x2x128xi32, #tpu.memory_space<vmem>>, vector<1x2x128xi32>
    %1 = vector.shape_cast %0 : vector<1x2x128xi32> to vector<2x128xi32>
    %c0_2 = arith.constant 0 : index
    %c0_3 = arith.constant 0 : index
    %c0_4 = arith.constant 0 : index
    %c0_5 = arith.constant 0 : index
    %2 = vector.load %arg2[%c0_2, %c0_3, %c0_4, %c0_5] : memref<1x4x2x128xf32, #tpu.memory_space<vmem>>, vector<1x1x2x128xf32>
    %3 = vector.shape_cast %2 : vector<1x1x2x128xf32> to vector<2x128xf32>
    %c0_6 = arith.constant 0 : index
    %c1 = arith.constant 1 : index
    %c0_7 = arith.constant 0 : index
    %c0_8 = arith.constant 0 : index
    %4 = vector.load %arg2[%c0_6, %c1, %c0_7, %c0_8] : memref<1x4x2x128xf32, #tpu.memory_space<vmem>>, vector<1x1x2x128xf32>
    %5 = vector.shape_cast %4 : vector<1x1x2x128xf32> to vector<2x128xf32>
    %6 = arith.maximumf %3, %5 : vector<2x128xf32>
    %c0_9 = arith.constant 0 : index
    %c2 = arith.constant 2 : index
    %c0_10 = arith.constant 0 : index
    %c0_11 = arith.constant 0 : index
    %7 = vector.load %arg2[%c0_9, %c2, %c0_10, %c0_11] : memref<1x4x2x128xf32, #tpu.memory_space<vmem>>, vector<1x1x2x128xf32>
    %8 = vector.shape_cast %7 : vector<1x1x2x128xf32> to vector<2x128xf32>
    %9 = arith.maximumf %6, %8 : vector<2x128xf32>
    %c0_12 = arith.constant 0 : index
    %c3 = arith.constant 3 : index
    %c0_13 = arith.constant 0 : index
    %c0_14 = arith.constant 0 : index
    %10 = vector.load %arg2[%c0_12, %c3, %c0_13, %c0_14] : memref<1x4x2x128xf32, #tpu.memory_space<vmem>>, vector<1x1x2x128xf32>
    %11 = vector.shape_cast %10 : vector<1x1x2x128xf32> to vector<2x128xf32>
    %12 = arith.maximumf %9, %11 : vector<2x128xf32>
    %cst = arith.constant 0.000000e+00 : f32
    %13 = vector.broadcast %cst : f32 to vector<2x128xf32>
    %cst_15 = arith.constant 0.000000e+00 : f32
    %14 = vector.broadcast %cst_15 : f32 to vector<2x128xf32>
    %c0_16 = arith.constant 0 : index
    %c0_17 = arith.constant 0 : index
    %c0_18 = arith.constant 0 : index
    %c0_19 = arith.constant 0 : index
    %15 = vector.load %arg2[%c0_16, %c0_17, %c0_18, %c0_19] : memref<1x4x2x128xf32, #tpu.memory_space<vmem>>, vector<1x1x2x128xf32>
    %16 = vector.shape_cast %15 : vector<1x1x2x128xf32> to vector<2x128xf32>
    %17 = arith.subf %16, %12 : vector<2x128xf32>
    %18 = math.exp %17 : vector<2x128xf32>
    %19 = arith.addf %13, %18 : vector<2x128xf32>
    %c0_i32 = arith.constant 0 : i32
    %20 = vector.broadcast %c0_i32 : i32 to vector<2x128xi32>
    %21 = arith.cmpi eq, %1, %20 : vector<2x128xi32>
    %cst_20 = arith.constant 0.000000e+00 : f32
    %22 = vector.broadcast %cst_20 : f32 to vector<2x128xf32>
    %23 = arith.select %21, %16, %22 : vector<2x128xi1>, vector<2x128xf32>
    %24 = arith.addf %14, %23 : vector<2x128xf32>
    %c0_21 = arith.constant 0 : index
    %c1_22 = arith.constant 1 : index
    %c0_23 = arith.constant 0 : index
    %c0_24 = arith.constant 0 : index
    %25 = vector.load %arg2[%c0_21, %c1_22, %c0_23, %c0_24] : memref<1x4x2x128xf32, #tpu.memory_space<vmem>>, vector<1x1x2x128xf32>
    %26 = vector.shape_cast %25 : vector<1x1x2x128xf32> to vector<2x128xf32>
    %27 = arith.subf %26, %12 : vector<2x128xf32>
    %28 = math.exp %27 : vector<2x128xf32>
    %29 = arith.addf %19, %28 : vector<2x128xf32>
    %c1_i32 = arith.constant 1 : i32
    %30 = vector.broadcast %c1_i32 : i32 to vector<2x128xi32>
    %31 = arith.cmpi eq, %1, %30 : vector<2x128xi32>
    %cst_25 = arith.constant 0.000000e+00 : f32
    %32 = vector.broadcast %cst_25 : f32 to vector<2x128xf32>
    %33 = arith.select %31, %26, %32 : vector<2x128xi1>, vector<2x128xf32>
    %34 = arith.addf %24, %33 : vector<2x128xf32>
    %c0_26 = arith.constant 0 : index
    %c2_27 = arith.constant 2 : index
    %c0_28 = arith.constant 0 : index
    %c0_29 = arith.constant 0 : index
    %35 = vector.load %arg2[%c0_26, %c2_27, %c0_28, %c0_29] : memref<1x4x2x128xf32, #tpu.memory_space<vmem>>, vector<1x1x2x128xf32>
    %36 = vector.shape_cast %35 : vector<1x1x2x128xf32> to vector<2x128xf32>
    %37 = arith.subf %36, %12 : vector<2x128xf32>
    %38 = math.exp %37 : vector<2x128xf32>
    %39 = arith.addf %29, %38 : vector<2x128xf32>
    %c2_i32 = arith.constant 2 : i32
    %40 = vector.broadcast %c2_i32 : i32 to vector<2x128xi32>
    %41 = arith.cmpi eq, %1, %40 : vector<2x128xi32>
    %cst_30 = arith.constant 0.000000e+00 : f32
    %42 = vector.broadcast %cst_30 : f32 to vector<2x128xf32>
    %43 = arith.select %41, %36, %42 : vector<2x128xi1>, vector<2x128xf32>
    %44 = arith.addf %34, %43 : vector<2x128xf32>
    %c0_31 = arith.constant 0 : index
    %c3_32 = arith.constant 3 : index
    %c0_33 = arith.constant 0 : index
    %c0_34 = arith.constant 0 : index
    %45 = vector.load %arg2[%c0_31, %c3_32, %c0_33, %c0_34] : memref<1x4x2x128xf32, #tpu.memory_space<vmem>>, vector<1x1x2x128xf32>
    %46 = vector.shape_cast %45 : vector<1x1x2x128xf32> to vector<2x128xf32>
    %47 = arith.subf %46, %12 : vector<2x128xf32>
    %48 = math.exp %47 : vector<2x128xf32>
    %49 = arith.addf %39, %48 : vector<2x128xf32>
    %c3_i32 = arith.constant 3 : i32
    %50 = vector.broadcast %c3_i32 : i32 to vector<2x128xi32>
    %51 = arith.cmpi eq, %1, %50 : vector<2x128xi32>
    %cst_35 = arith.constant 0.000000e+00 : f32
    %52 = vector.broadcast %cst_35 : f32 to vector<2x128xf32>
    %53 = arith.select %51, %46, %52 : vector<2x128xi1>, vector<2x128xf32>
    %54 = arith.addf %44, %53 : vector<2x128xf32>
    %55 = math.log %49 : vector<2x128xf32>
    %56 = arith.addf %12, %55 : vector<2x128xf32>
    %57 = arith.subf %56, %54 : vector<2x128xf32>
    %c0_36 = arith.constant 0 : index
    %c0_37 = arith.constant 0 : index
    %c0_38 = arith.constant 0 : index
    %58 = vector.load %arg4[%c0_36, %c0_37, %c0_38] : memref<1x2x128xf32, #tpu.memory_space<vmem>>, vector<1x2x128xf32>
    %59 = vector.shape_cast %58 : vector<1x2x128xf32> to vector<2x128xf32>
    %c0_39 = arith.constant 0 : index
    %c0_40 = arith.constant 0 : index
    %c0_41 = arith.constant 0 : index
    %60 = vector.load %arg5[%c0_39, %c0_40, %c0_41] : memref<1x2x128xf32, #tpu.memory_space<vmem>>, vector<1x2x128xf32>
    %61 = vector.shape_cast %60 : vector<1x2x128xf32> to vector<2x128xf32>
    %62 = arith.subf %59, %61 : vector<2x128xf32>
    %63 = math.absf %62 : vector<2x128xf32>
    %cst_42 = arith.constant dense<0.000000e+00> : vector<128xf32>
    %64 = vector.multi_reduction <add>, %57, %cst_42 [0] : vector<2x128xf32> to vector<128xf32>
    %65 = vector.shape_cast %64 : vector<128xf32> to vector<1x128xf32>
    %cst_43 = arith.constant dense<0.000000e+00> : vector<128xf32>
    %66 = vector.multi_reduction <add>, %63, %cst_43 [0] : vector<2x128xf32> to vector<128xf32>
    %67 = vector.shape_cast %66 : vector<128xf32> to vector<1x128xf32>
    %68 = tpu.iota {dimensions = array<i32: 0>} : vector<8x128xi32>
    %c0_i32_44 = arith.constant 0 : i32
    %69 = vector.broadcast %c0_i32_44 : i32 to vector<8x128xi32>
    %70 = arith.cmpi eq, %68, %69 : vector<8x128xi32>
    %c1_i32_45 = arith.constant 1 : i32
    %71 = vector.broadcast %c1_i32_45 : i32 to vector<8x128xi32>
    %72 = arith.cmpi eq, %68, %71 : vector<8x128xi32>
    %cst_46 = arith.constant 0.000000e+00 : f32
    %73 = vector.shape_cast %67 : vector<1x128xf32> to vector<1x128xf32>
    %74 = vector.broadcast %73 : vector<1x128xf32> to vector<8x128xf32>
    %75 = vector.broadcast %cst_46 : f32 to vector<8x128xf32>
    %76 = arith.select %72, %74, %75 : vector<8x128xi1>, vector<8x128xf32>
    %77 = vector.shape_cast %65 : vector<1x128xf32> to vector<1x128xf32>
    %78 = vector.broadcast %77 : vector<1x128xf32> to vector<8x128xf32>
    %79 = arith.select %70, %78, %76 : vector<8x128xi1>, vector<8x128xf32>
    %c0_47 = arith.constant 0 : index
    %c0_48 = arith.constant 0 : index
    %c0_49 = arith.constant 0 : index
    %c0_50 = arith.constant 0 : index
    %80 = vector.load %arg10[%c0_47, %c0_48, %c0_49, %c0_50] : memref<1x1x8x128xf32, #tpu.memory_space<vmem>>, vector<1x1x8x128xf32>
    %81 = vector.shape_cast %80 : vector<1x1x8x128xf32> to vector<8x128xf32>
    %82 = vector.shape_cast %79 : vector<8x128xf32> to vector<1x1x8x128xf32>
    tpu.vector_store %arg10[%c0_47, %c0_48, %c0_49, %c0_50], %82 {strides = array<i32>} : memref<1x1x8x128xf32, #tpu.memory_space<vmem>>, vector<1x1x8x128xf32>,
    %c0_i32_51 = arith.constant 0 : i32
    %83 = arith.cmpi eq, %arg0, %c0_i32_51 : i32
    %c0_i32_52 = arith.constant 0 : i32
    %84 = arith.cmpi eq, %arg1, %c0_i32_52 : i32
    %85 = arith.andi %83, %84 : i1
    %86 = arith.extui %85 : i1 to i32
    %c0_i32_53 = arith.constant 0 : i32
    %87 = arith.cmpi ne, %86, %c0_i32_53 : i32
    scf.if %87 {
      %c0_54 = arith.constant 0 : index
      %c0_55 = arith.constant 0 : index
      %88 = vector.load %arg6[%c0_54, %c0_55] : memref<2x8xf32, #tpu.memory_space<vmem>>, vector<2x8xf32>
      %c0_56 = arith.constant 0 : index
      %c0_57 = arith.constant 0 : index
      %89 = vector.load %arg7[%c0_56, %c0_57] : memref<2x1xi32, #tpu.memory_space<vmem>>, vector<2x1xi32>
      %cst_58 = arith.constant dense<0xFF800000> : vector<2xf32>
      %90 = vector.multi_reduction <maximumf>, %88, %cst_58 [1] : vector<2x8xf32> to vector<2xf32>
      %91 = vector.shape_cast %90 : vector<2xf32> to vector<2x1xf32>
      %92 = vector.broadcast %91 : vector<2x1xf32> to vector<2x8xf32>
      %93 = arith.subf %88, %92 : vector<2x8xf32>
      %94 = math.exp %93 : vector<2x8xf32>
      %cst_59 = arith.constant dense<0.000000e+00> : vector<2xf32>
      %95 = vector.multi_reduction <add>, %94, %cst_59 [1] : vector<2x8xf32> to vector<2xf32>
      %96 = vector.shape_cast %95 : vector<2xf32> to vector<2x1xf32>
      %97 = math.log %96 : vector<2x1xf32>
      %98 = arith.addf %91, %97 : vector<2x1xf32>
      %99 = tpu.iota {dimensions = array<i32: 1>} : vector<2x8xi32>
      %100 = vector.broadcast %89 : vector<2x1xi32> to vector<2x8xi32>
      %101 = arith.cmpi eq, %99, %100 : vector<2x8xi32>
      %cst_60 = arith.constant 0.000000e+00 : f32
      %102 = vector.broadcast %cst_60 : f32 to vector<2x8xf32>
      %103 = arith.select %101, %88, %102 : vector<2x8xi1>, vector<2x8xf32>
      %cst_61 = arith.constant dense<0.000000e+00> : vector<2xf32>
      %104 = vector.multi_reduction <add>, %103, %cst_61 [1] : vector<2x8xf32> to vector<2xf32>
      %105 = vector.shape_cast %104 : vector<2xf32> to vector<2x1xf32>
      %106 = arith.subf %98, %105 : vector<2x1xf32>
      %107 = vector.shape_cast %106 : vector<2x1xf32> to vector<1x2x1xf32>
      %cst_62 = arith.constant dense<0.000000e+00> : vector<1xf32>
      %108 = vector.multi_reduction <add>, %107, %cst_62 [1, 2] : vector<1x2x1xf32> to vector<1xf32>
      %109 = vector.shape_cast %108 : vector<1xf32> to vector<1x1x1xf32>
      %110 = vector.extract %109[0, 0, 0] : f32 from vector<1x1x1xf32>
      %cst_63 = arith.constant 5.000000e-01 : f32
      %111 = arith.mulf %110, %cst_63 : f32
      %c0_64 = arith.constant 0 : index
      %c0_65 = arith.constant 0 : index
      %112 = vector.load %arg8[%c0_64, %c0_65] : memref<2x4xf32, #tpu.memory_space<vmem>>, vector<2x4xf32>
      %c0_66 = arith.constant 0 : index
      %c0_67 = arith.constant 0 : index
      %113 = vector.load %arg9[%c0_66, %c0_67] : memref<2x4xf32, #tpu.memory_space<vmem>>, vector<2x4xf32>
      %114 = arith.subf %112, %113 : vector<2x4xf32>
      %115 = arith.mulf %114, %114 : vector<2x4xf32>
      %116 = vector.shape_cast %115 : vector<2x4xf32> to vector<1x2x4xf32>
      %cst_68 = arith.constant dense<0.000000e+00> : vector<1xf32>
      %117 = vector.multi_reduction <add>, %116, %cst_68 [1, 2] : vector<1x2x4xf32> to vector<1xf32>
      %118 = vector.shape_cast %117 : vector<1xf32> to vector<1x1x1xf32>
      %119 = vector.extract %118[0, 0, 0] : f32 from vector<1x1x1xf32>
      %cst_69 = arith.constant 1.250000e-01 : f32
      %120 = arith.mulf %119, %cst_69 : f32
      %c0_i32_70 = arith.constant 0 : i32
      %121 = vector.broadcast %c0_i32_70 : i32 to vector<8x128xi32>
      %122 = arith.cmpi eq, %68, %121 : vector<8x128xi32>
      %c1_i32_71 = arith.constant 1 : i32
      %123 = vector.broadcast %c1_i32_71 : i32 to vector<8x128xi32>
      %124 = arith.cmpi eq, %68, %123 : vector<8x128xi32>
      %c2_i32_72 = arith.constant 2 : i32
      %125 = vector.broadcast %c2_i32_72 : i32 to vector<8x128xi32>
      %126 = arith.cmpi eq, %68, %125 : vector<8x128xi32>
      %c3_i32_73 = arith.constant 3 : i32
      %127 = vector.broadcast %c3_i32_73 : i32 to vector<8x128xi32>
      %128 = arith.cmpi eq, %68, %127 : vector<8x128xi32>
      %cst_74 = arith.constant 0.000000e+00 : f32
      %129 = vector.broadcast %120 : f32 to vector<8x128xf32>
      %130 = vector.broadcast %cst_74 : f32 to vector<8x128xf32>
      %131 = arith.select %128, %129, %130 : vector<8x128xi1>, vector<8x128xf32>
      %132 = vector.broadcast %111 : f32 to vector<8x128xf32>
      %133 = arith.select %126, %132, %131 : vector<8x128xi1>, vector<8x128xf32>
      %134 = vector.shape_cast %67 : vector<1x128xf32> to vector<1x128xf32>
      %135 = vector.broadcast %134 : vector<1x128xf32> to vector<8x128xf32>
      %136 = arith.select %124, %135, %133 : vector<8x128xi1>, vector<8x128xf32>
      %137 = vector.shape_cast %65 : vector<1x128xf32> to vector<1x128xf32>
      %138 = vector.broadcast %137 : vector<1x128xf32> to vector<8x128xf32>
      %139 = arith.select %122, %138, %136 : vector<8x128xi1>, vector<8x128xf32>
      %c0_75 = arith.constant 0 : index
      %c0_76 = arith.constant 0 : index
      %c0_77 = arith.constant 0 : index
      %c0_78 = arith.constant 0 : index
      %140 = vector.load %arg10[%c0_75, %c0_76, %c0_77, %c0_78] : memref<1x1x8x128xf32, #tpu.memory_space<vmem>>, vector<1x1x8x128xf32>
      %141 = vector.shape_cast %140 : vector<1x1x8x128xf32> to vector<8x128xf32>
      %142 = vector.shape_cast %139 : vector<8x128xf32> to vector<1x1x8x128xf32>
      tpu.vector_store %arg10[%c0_75, %c0_76, %c0_77, %c0_78], %142 {strides = array<i32>} : memref<1x1x8x128xf32, #tpu.memory_space<vmem>>, vector<1x1x8x128xf32>,
    } else {
    }
    return
  }
  func.func @transform_0(%arg0: i32, %arg1: i32) -> (i32, i32, i32, i32) {
    %c0_i32 = arith.constant 0 : i32
    %c0_i32_0 = arith.constant 0 : i32
    %c0_i32_1 = arith.constant 0 : i32
    return %arg0, %c0_i32, %arg1, %c0_i32_0 : i32, i32, i32, i32
  }
  func.func @transform_1(%arg0: i32, %arg1: i32) -> (i32, i32, i32) {
    %c0_i32 = arith.constant 0 : i32
    %c0_i32_0 = arith.constant 0 : i32
    return %arg0, %arg1, %c0_i32 : i32, i32, i32
  }
  func.func @transform_2(%arg0: i32, %arg1: i32) -> (i32, i32, i32) {
    %c0_i32 = arith.constant 0 : i32
    %c0_i32_0 = arith.constant 0 : i32
    return %arg0, %arg1, %c0_i32 : i32, i32, i32
  }
  func.func @transform_3(%arg0: i32, %arg1: i32) -> (i32, i32, i32) {
    %c0_i32 = arith.constant 0 : i32
    %c0_i32_0 = arith.constant 0 : i32
    return %arg0, %arg1, %c0_i32 : i32, i32, i32
  }
  func.func @transform_4(%arg0: i32, %arg1: i32) -> (i32, i32) {
    %c0_i32 = arith.constant 0 : i32
    %c0_i32_0 = arith.constant 0 : i32
    %c0_i32_1 = arith.constant 0 : i32
    return %c0_i32, %c0_i32_0 : i32, i32
  }
  func.func @transform_5(%arg0: i32, %arg1: i32) -> (i32, i32) {
    %c0_i32 = arith.constant 0 : i32
    %c0_i32_0 = arith.constant 0 : i32
    %c0_i32_1 = arith.constant 0 : i32
    return %c0_i32, %c0_i32_0 : i32, i32
  }
  func.func @transform_6(%arg0: i32, %arg1: i32) -> (i32, i32) {
    %c0_i32 = arith.constant 0 : i32
    %c0_i32_0 = arith.constant 0 : i32
    %c0_i32_1 = arith.constant 0 : i32
    return %c0_i32, %c0_i32_0 : i32, i32
  }
  func.func @transform_7(%arg0: i32, %arg1: i32) -> (i32, i32) {
    %c0_i32 = arith.constant 0 : i32
    %c0_i32_0 = arith.constant 0 : i32
    %c0_i32_1 = arith.constant 0 : i32
    return %c0_i32, %c0_i32_0 : i32, i32
  }
  func.func @transform_8(%arg0: i32, %arg1: i32) -> (i32, i32, i32, i32) {
    %c0_i32 = arith.constant 0 : i32
    %c0_i32_0 = arith.constant 0 : i32
    %c0_i32_1 = arith.constant 0 : i32
    return %arg0, %arg1, %c0_i32, %c0_i32_0 : i32, i32, i32, i32
  }
}

</mosaic_0001>

<bundles_post_ra>
// kernel: tpu_custom_call.1
= control target key start
LH: loop header
LB: loop body
LE: loop exit
PB: predicated region body
PF: predicated region fallthrough
CT: control target
= control target key end

     0   :  { %13 = vsyncpa [#allocation3], 0  ;;  %s1204_s0 = inlined_call_operand.hbm [shape: f32[2,4,2,128], index: 0, kind: input, shape index: {}]   ;;  %s1205_s1 = inlined_call_operand.vmem [shape: s32[2,2,128], index: 1, kind: input, shape index: {}]   ;;  %s1206_s2 = inlined_call_operand.vmem [shape: f32[2,2,128], index: 2, kind: input, shape index: {}]   ;;  %s1207_s3 = inlined_call_operand.vmem [shape: f32[2,2,128], index: 3, kind: input, shape index: {}]   ;;  %s1208_s4 = inlined_call_operand.vmem [shape: f32[2,8], index: 4, kind: input, shape index: {}]   ;;  %s1209_s5 = inlined_call_operand.vmem [shape: s32[2,1], index: 5, kind: input, shape index: {}]   ;;  %s1210_s6 = inlined_call_operand.vmem [shape: f32[2,4], index: 6, kind: input, shape index: {}]   ;;  %s1211_s7 = inlined_call_operand.vmem [shape: f32[2,4], index: 7, kind: input, shape index: {}]   ;;  %s1212_s8 = inlined_call_operand.hbm [shape: f32[2,1,8,128], index: 8, kind: output, shape index: {}]  }
   0x1   :  { %15 = vsyncpa [#allocation3 + $0x1], 0 }
   0x2   :  { %16 = vsyncpa [#allocation4], 0 }
   0x3   :  { %18 = vsyncpa [#allocation4 + $0x1], 0  ;;  %s975_s27 = smov 0   ;;  %s977_s28 = smov 0  }
   0x4   :  { %s979_s29 = smov 0   ;;  %s981_s30 = smov 0  }
   0x5   :  { %s983_s9 = smov 0   ;;  %s985_s10 = smov 0  }
   0x6 LB: > { %s704_s11 = sadd.s32 4294967295, %s923_s10   ;;  %s705_s12 = sadd.s32 4294967294, %s923_s10   ;;  %s923_s10 = sphi %s985_s10, %s24_s10   ;;  %s919_s9 = sphi %s983_s9, %s1229_s9   ;;  %s915_s30 = sphi %s981_s30, %s1228_s30   ;;  %s911_s29 = sphi %s979_s29, %s1227_s29   ;;  %s907_s28 = sphi %s977_s28, %s1226_s28   ;;  %s903_s27 = sphi %s975_s27, %s1225_s27  }
   0x7   : > { %s36_s13 = sadd.s32 1, %s919_s9  ;;  %s45_s14 = sadd.s32 1, %s911_s29 }
   0x8   : > { %p38_p0 = scmp.ge.s32.totalorder %s36_s13, 2  ;;  %p52_p1 = scmp.ne.s32.totalorder %s911_s29, %s907_s28 }
   0x9   : > { %p53_p2 = scmp.eq.s32.totalorder %s923_s10, 0  ;;  %p58_p3 = scmp.ne.s32.totalorder %s907_s28, %s903_s27 }
   0xa   : > { %s1231_s13 = smov (%p38_p0, %s36_s13), 0  ;;  %p59_p5 = scmp.eq.s32.totalorder %s704_s11, 0 }
   0xb   : > { %p1016_p4 = por %p53_p2, %p52_p1  ;;  %s40_s16 = ssub.s32 %s919_s9, %s1231_s13 }
   0xc   : > { %p252_p6 = scmp.eq.s32.totalorder %s704_s11, 1  ;;  %p43_p7 = scmp.eq.s32.totalorder %s40_s16, 0 }
   0xd   : > { %p1022_p8 = por %p59_p5, %p58_p3  ;;  %p258_p10 = scmp.eq.s32.totalorder %s705_s12, 1 }
   0xe   : > { %p1026_p9 = por %p252_p6, %p52_p1  ;;  %p743_p13 = scmp.lt.s32.totalorder %s923_s10, 2 }
   0xf   : > { %s1031_s19 = scalar_select %p43_p7, %s911_s29, %s45_s14  }
  0x10   : > { %s1217_s18 = scalar_select %p1026_p9, 1, 0 }
  0x11   : > { %p1033_p11 = por %p258_p10, %p58_p3  ;;  %s290_s21 = sand.u32 1, %s911_s29  }
  0x12   : > { %s708_s22 = sshll.u32 %s290_s21, 3  ;;  %s725_s23 = sshll.u32 %s919_s9, 7 }
  0x13   : > { %s1218_s20 = scalar_select %p1033_p11, 1, 0 }
  0x14   : > { %s1044_s26 = scalar_lea.hbm %s1204_s0, %s725_s23  ;;  %s294_s11 = scalar_lea.vmem [#allocation2], %s708_s22 }
  0x15   : > { %s302_s12 = sshll.u32 %s294_s11, 4  ;;  %p1050_p0 = pnand %p743_p13, %p1016_p4  ;;  %s1046_s12 = int_to_ptr.vmem [resolvable:$true] %s302_s12 }
  0x16   : > { %s1055_s16 = scalar_lea.sflag [#allocation3], %s290_s21  ;;  %s811_s23 = scalar_lea.hbm %s1044_s26, 128 }
  0x17   : > { %p812_p2 = scmp.ne.s32.totalorder %s1044_s26, %s811_s23  ;;  %p813_p3 = pneg %p1050_p0 }
  0x18   : > { %s816_s15 = scalar_lea.hbm %s1204_s0, 256  ;;  %p817_p4 = scmp.lt.u32.totalorder %s1044_s26, %s1204_s0 }
  0x19   : > { %p814_p5 = pnand %p813_p3, %p812_p2  ;;  %p818_p7 = scmp.lt.u32.totalorder %s816_s15, %s811_s23 }
  0x1a   : > { %p820_p13 = scmp.lt.u32.totalorder %s811_s23, %s1044_s26 }
  0x1b   : > { %p815_p6 = pneg %p814_p5  ;;  %p819_p10 = por %p818_p7, %p817_p4 }
  0x1d   : > { %p821_p12 = por %p820_p13, %p819_p10 }
  0x1f   : > { %p822_p1 = pnand %p821_p12, %p815_p6 }
  0x21   : > { %825 = shalt.err (!%p822_p1)
}
  0x22   : > { %s826_s21 = scalar_lea.vmem %s1046_s12, 128  ;;  %s925_s22 = smov [#allocation2]  }
  0x23   : > { %p827_p2 = scmp.ne.s32.totalorder %s1046_s12, %s826_s21  ;;  %s831_s24 = sshll.u32 %s925_s22, 4  ;;  %s832_s24 = int_to_ptr.vmem [resolvable:$false] %s831_s24 }
  0x24   : > { %s833_s25 = scalar_lea.vmem %s832_s24, 256  ;;  %p834_p9 = scmp.lt.s32.totalorder %s1046_s12, %s832_s24 }
  0x25   : > { %p829_p5 = pnand %p827_p2, %p813_p3  ;;  %p835_p4 = scmp.lt.s32.totalorder %s833_s25, %s826_s21 }
  0x27   : > { %p830_p11 = pneg %p829_p5  ;;  %p836_p7 = por %p835_p4, %p834_p9 }
  0x29   : > { %p837_p10 = pnand %p836_p7, %p830_p11 }
  0x2b   : > { %840 = shalt.err (!%p837_p10)
}
  0x2c   : > { %s926_s23 = smov 32   ;;  %s927_s15 = smov 2  }
  0x2d   : > { %738 = dma.hbm_to_vmem [thread:$0]  (!%p1050_p0), %s1044_s26, 128, %s1046_s12, %s1055_s16, %s926_s23, %s926_s23, %s927_s15  }
  0x2e   : > { %p340_p12 = scmp.lt.s32.totalorder %s923_s10, 3  ;;  %p1220_p1 = scmp.ge.s32.totalorder %s923_s10, 1 }
  0x30   : > { %p341_p3 = pnand %p1220_p1, %p340_p12 }
  0x31   : > { %s1087_s11 = sand.u32 (!%p341_p3), 1, %s907_s28  }
  0x32   : > { %344 = sbr.rel (%p341_p3) target bundleno = 622 (0x26e), region = 52  ;;  %s1214_s21 = sshll.u32 (!%p341_p3), %s1087_s11, 3 }
  0x33   : > { %s347_s22 = scalar_lea.sflag (!%p341_p3), [#allocation3], %s1087_s11  ;;  %s350_s24 = scalar_lea.vmem (!%p341_p3), [#allocation2], %s1214_s21 }
  0x39   : > { %894 = dma.done.wait (%p1022_p8), %s347_s22, 128  }
  0x3a   : > { %896 = vsyncadd (%p1022_p8), %s347_s22, 4294967168  ;;  %p494_p9 = scmp.eq.s32.totalorder %s915_s30, 0  ;;  %v426_v0 = vld [vmem:[%s350_s24] sm:$0x3]  ;;  %v717_v1 = vld [vmem:[%s350_s24 + $0x2] sm:$0x3]  ;;  %v487_v43 = vlaneseq }
  0x3b   : > { %v429_v2 = vmax.f32 %v426_v0, %v717_v1  ;;  %v718_v3 = vld [vmem:[%s350_s24 + $0x4] sm:$0x3]  ;;  %v719_v4 = vld [vmem:[%s350_s24 + $0x6] sm:$0x3]  ;;  %p404_p11 = scmp.lt.s32.totalorder %s915_s30, 1  ;;  %vm472_vm2 = vcmask 1041408  }
  0x3c   : > { %v1111_v48 = vshrl.u32 %v487_v43, 7  ;;  %v500_v56 = vld [vmem:[%s1208_s4] sm:$0x3] (%p494_p9)  ;;  %vm502_vm7 = vcmask (%p494_p9), 58368   ;;  %v928_v58 = vmov (%p494_p9), 0   ;;  %v516_v63 = vand.u32 (%p494_p9), 127, %v487_v43 }
  0x3d   : > { %v432_v5 = vmax.f32 %v429_v2, %v718_v3  ;;  %s405_s17 = scalar_select %p404_p11, %s915_s30, 1 }
  0x3e   : > { %vm490_vm5 = vcmp.eq.s32.totalorder %v1111_v48, 1  ;;  %vm489_vm6 = vcmp.eq.s32.totalorder %v1111_v48, 0  ;;  %v503_v57 = vsel (%p494_p9), %vm502_vm7, %v500_v56, -inf  ;;  %806 = vset.pattern.permute.xlu0 (%p494_p9), %v928_v58  ;;  %v501_v59 = vld [vmem:[%s1209_s5] sm:$0x3] (%p494_p9)  ;;  %vm526_vm9 = vcmask (%p494_p9), 1024  }
  0x3f   : > { %v435_v6 = vmax.f32 %v432_v5, %v719_v4  ;;  %s714_s26 = sshll.u32 %s405_s17, 1  ;;  %504 = vmax.xlane.f32.xlu0 (%p494_p9), %v503_v57  ;;  %vm542_vm10 = vcmask (%p494_p9), 25600   ;;  %vm555_vm11 = vcmp.eq.s32.totalorder (%p494_p9), %v1111_v48, 3  ;;  %vm554_vm12 = vcmp.eq.s32.totalorder (%p494_p9), %v1111_v48, 2 }
  0x40   : > { %s417_s16 = scalar_lea.vmem %s1206_s2, %s714_s26  ;;  %s424_s15 = scalar_lea.vmem %s1207_s3, %s714_s26 }
  0x41   : > { %v436_v7 = vsub.f32 %v426_v0, %v435_v6  ;;  %v443_v8 = vsub.f32 %v717_v1, %v435_v6  ;;  %v450_v9 = vsub.f32 %v718_v3, %v435_v6  ;;  %v457_v10 = vsub.f32 %v719_v4, %v435_v6  ;;  %v468_v15 = vld [vmem:[%s417_s16] sm:$0x3]  ;;  %s410_s21 = scalar_lea.vmem %s1205_s1, %s714_s26 }
  0x42   : > { %v469_v16 = vld [vmem:[%s424_s15] sm:$0x3] }
  0x43   : > { %v437_v11 = vmul.f32 1.442695, %v436_v7  ;;  %v444_v12 = vmul.f32 1.442695, %v443_v8  ;;  %v451_v13 = vmul.f32 1.442695, %v450_v9  ;;  %v470_v18 = vsub.f32 %v468_v15, %v469_v16 }
  0x44   : > { %v458_v14 = vmul.f32 1.442695, %v457_v10  ;;  %v425_v21 = vld [vmem:[%s410_s21] sm:$0x3]  ;;  %s1221_s21 = sshll.u32 %s1087_s11, 3 }
  0x45   : > { %796 = vpow2.f32 %v437_v11  ;;  %v471_v25 = vand.u32 2147483647, %v470_v18  ;;  %vm440_vm0 = vcmp.eq.s32.totalorder %v425_v21, 0  ;;  %vm447_vm1 = vcmp.eq.s32.totalorder %v425_v21, 1  ;;  %s1127_s17 = scalar_lea.vmem [#allocation5], %s1221_s21 }
  0x46   : > { %798 = vpow2.f32 %v444_v12  ;;  %v441_v27 = vsel %vm440_vm0, %v426_v0, 0.0  ;;  %v448_v28 = vsel %vm447_vm1, %v717_v1, 0.0  ;;  %vm454_vm3 = vcmp.eq.s32.totalorder %v425_v21, 2  ;;  %v539_v7 = vld [vmem:[%s1211_s7] sm:$0x3] (%p494_p9) }
  0x47   : > { %800 = vpow2.f32 %v451_v13  ;;  %v480_v29 = vsel %vm472_vm2, %v471_v25, 0.0  ;;  %v449_v30 = vadd.f32 %v448_v28, %v441_v27  ;;  %v455_v32 = vsel %vm454_vm3, %v718_v3, 0.0 }
  0x48   : > { %802 = vpow2.f32 %v458_v14  ;;  %v481_v31 = vrot.slane %v480_v29, 4  ;;  %vm461_vm4 = vcmp.eq.s32.totalorder %v425_v21, 3 }
  0x49   : > { %v456_v33 = vadd.f32 %v455_v32, %v449_v30  ;;  %v462_v35 = vsel %vm461_vm4, %v719_v4, 0.0 }
  0x4a   : > { %v482_v34 = vadd.f32 %v481_v31, %v480_v29 }
  0x4b   : > { %v463_v37 = vadd.f32 %v462_v35, %v456_v33 }
  0x4c   : > { %v483_v39 = vrot.slane %v482_v34, 2 }
  0x4e   : > { %v484_v42 = vadd.f32 %v483_v39, %v482_v34 }
  0x4f   : > { %v797_v17 = vpop.eup %796 }
  0x50   : > { %v799_v19 = vpop.eup %798  ;;  %v485_v46 = vrot.slane %v484_v42, 1 }
  0x51   : > { %v801_v20 = vpop.eup %800  ;;  %v446_v22 = vadd.f32 %v799_v19, %v797_v17 }
  0x52   : > { %v803_v23 = vpop.eup %802  ;;  %v1113_v50 = vadd.f32 %v485_v46, %v484_v42 }
  0x53   : > { %v453_v24 = vadd.f32 %v801_v20, %v446_v22 }
  0x54   : > { %v491_v53 = vsel %vm490_vm5, %v1113_v50, 0.0 }
  0x55   : > { %v460_v26 = vadd.f32 %v803_v23, %v453_v24  ;;  %518 = vperm.xlu0 (%p494_p9), %806, %v501_v59  }
  0x57   : > { %804 = vlog2.f32 %v460_v26 }
  0x61   : > { %v805_v36 = vpop.eup %804 }
  0x62   : > { %v465_v38 = vmul.f32 0.6931472, %v805_v36 }
  0x64   : > { %v466_v40 = vadd.f32 %v465_v38, %v435_v6  ;;  %v538_v6 = vld [vmem:[%s1210_s6] sm:$0x3] (%p494_p9) }
  0x65   : > { %v540_v10 = vsub.f32 (%p494_p9), %v538_v6, %v539_v7 }
  0x66   : > { %v467_v41 = vsub.f32 %v466_v40, %v463_v37 }
  0x67   : > { %v541_v14 = vmul.f32 (%p494_p9), %v540_v10, %v540_v10 }
  0x68   : > { %v473_v44 = vsel %vm472_vm2, %v467_v41, 0.0 }
  0x69   : > { %v474_v45 = vrot.slane %v473_v44, 4  ;;  %v543_v16 = vsel (%p494_p9), %vm542_vm10, %v541_v14, 0.0 }
  0x6b   : > { %v475_v47 = vadd.f32 %v474_v45, %v473_v44 }
  0x6d   : > { %v476_v49 = vrot.slane %v475_v47, 2 }
  0x6f   : > { %v477_v51 = vadd.f32 %v476_v49, %v475_v47 }
  0x70   : > { %499 = sbr.rel (!%p494_p9) target bundleno = 597 (0x255), region = 60 }
  0x71   : > { %v478_v52 = vrot.slane %v477_v51, 1 }
  0x73   : > { %v1120_v54 = vadd.f32 %v478_v52, %v477_v51 }
  0x75   : > { %v492_v55 = vsel %vm489_vm6, %v1120_v54, %v491_v53 }
  0x76   : > { %493 = vst [vmem:[%s1127_s17] sm:$0xff] %v492_v55 }
  0xcc   : > { %v505_v60 = vpop.xlane.xlu0 %504 }
  0xcd   : > { %v506_v61 = vsub.f32 %v500_v56, %v505_v60 }
  0xcf   : > { %v507_v62 = vmul.f32 1.442695, %v506_v61 }
  0xd1   : > { %807 = vpow2.f32 %v507_v62 }
  0xd4   : > { %v519_v0 = vpop.permute.xlu0 %518 }
  0xd5   : > { %vm520_vm8 = vcmp.eq.s32.totalorder %v516_v63, %v519_v0 }
  0xd6   : > { %v521_v2 = vsel %vm520_vm8, %v500_v56, 0.0 }
  0xd7   : > { %v522_v4 = vsel %vm502_vm7, %v521_v2, 0.0 }
  0xdb   : > { %v808_v1 = vpop.eup %807 }
  0xdc   : > { %v509_v3 = vsel %vm502_vm7, %v808_v1, 0.0 }
  0xdd   : > { %510 = vadd.xlane.f32.xlu1 %v509_v3 }
  0xe1   : > { %523 = vadd.xlane.f32.xlu1 %v522_v4 }
 0x16a   : > { %v511_v5 = vpop.xlane.xlu1 %510 }
 0x16b   : > { %809 = vlog2.f32 %v511_v5 }
 0x16e   : > { %v524_v11 = vpop.xlane.xlu1 %523 }
 0x175   : > { %v810_v8 = vpop.eup %809 }
 0x176   : > { %v513_v9 = vmul.f32 0.6931472, %v810_v8 }
 0x178   : > { %v514_v12 = vadd.f32 %v513_v9, %v505_v60 }
 0x17a   : > { %v525_v13 = vsub.f32 %v514_v12, %v524_v11 }
 0x17c   : > { %v527_v15 = vsel %vm526_vm9, %v525_v13, 0.0 }
 0x17d   : > { %528 = vadd.xlane.f32.xlu1 %v527_v15 }
 0x181   : > { %544 = vadd.xlane.f32.xlu1 %v543_v16 }
 0x20a   : > { %v529_v17 = vpop.xlane.xlu1 %528 }
 0x20b   : > { %v530_v18 = vrot.slane %v529_v17, 4 }
 0x20d   : > { %v531_v19 = vadd.f32 %v530_v18, %v529_v17 }
 0x20e   : > { %v545_v20 = vpop.xlane.xlu1 %544 }
 0x20f   : > { %v532_v21 = vrot.slane %v531_v19, 2  ;;  %v546_v22 = vrot.slane %v545_v20, 4 }
 0x211   : > { %v547_v23 = vadd.f32 %v546_v22, %v545_v20  ;;  %v533_v24 = vadd.f32 %v532_v21, %v531_v19 }
 0x213   : > { %v548_v25 = vrot.slane %v547_v23, 2  ;;  %v534_v26 = vrot.slane %v533_v24, 1 }
 0x215   : > { %v549_v27 = vadd.f32 %v548_v25, %v547_v23  ;;  %v535_v28 = vadd.f32 %v534_v26, %v533_v24 }
 0x217   : > { %727 = vpush %v535_v28  ;;  %v550_v29 = vrot.slane %v549_v27, 1 }
 0x219   : > { %v551_v30 = vadd.f32 %v550_v29, %v549_v27 }
 0x21b   : > { %729 = vpush %v551_v30 }
 0x248   : > { %s728_s24 = spop %727 }
 0x249   : > { %s537_s21 = smul.f32 0.5, %s728_s24 }
 0x24b   : > { %v558_v32 = vstv %s537_s21 }
 0x24c   : > { %s730_s26 = spop %729 }
 0x24d   : > { %s553_s12 = smul.f32 0.125, %s730_s26 }
 0x24f   : > { %v556_v31 = vstv %s553_s12 }
 0x250   : > { %v557_v33 = vsel %vm555_vm11, %v556_v31, 0.0 }
 0x251   : > { %v559_v34 = vsel %vm554_vm12, %v558_v32, %v557_v33 }
 0x252   : > { %v560_v35 = vsel %vm490_vm5, %v1113_v50, %v559_v34 }
 0x253   : > { %v561_v36 = vsel %vm489_vm6, %v1120_v54, %v560_v35 }
 0x254   : > { %562 = vst [vmem:[%s1127_s17] sm:$0xff] %v561_v36 }
 0x255 PF: > { %s722_s14 = sshll.u32 %s915_s30, 7  ;;  %s578_s15 = sshll.u32 %s1127_s17, 4  ;;  %s579_s15 = int_to_ptr.vmem [resolvable:$true] %s578_s15 }
 0x256   : > { %s1160_s23 = scalar_lea.hbm %s1212_s8, %s722_s14  ;;  %s564_s22 = scalar_lea.sflag [#allocation4], %s1087_s11 }
 0x257   : > { %s841_s24 = scalar_lea.vmem %s579_s15, 128  ;;  %p1222_p0 = scmp.ne.s32.totalorder %s1217_s18, 0 }
 0x258   : > { %p842_p8 = scmp.ne.s32.totalorder %s579_s15, %s841_s24  ;;  %s929_s21 = smov [#allocation5]  }
 0x259   : > { %s845_s26 = sshll.u32 %s929_s21, 4  ;;  %s846_s26 = int_to_ptr.vmem [resolvable:$false] %s845_s26 }
 0x25a   : > { %p843_p6 = pnand %p842_p8, %p1222_p0  ;;  %s847_s12 = scalar_lea.vmem %s846_s26, 256 }
 0x25b   : > { %p848_p2 = scmp.lt.s32.totalorder %s579_s15, %s846_s26  ;;  %p849_p5 = scmp.lt.s32.totalorder %s847_s12, %s841_s24 }
 0x25c   : > { %p844_p13 = pneg %p843_p6 }
 0x25d   : > { %p850_p4 = por %p849_p5, %p848_p2 }
 0x25f   : > { %p851_p7 = pnand %p850_p4, %p844_p13 }
 0x261   : > { %854 = shalt.err (!%p851_p7)
}
 0x262   : > { %s855_s30 = scalar_lea.hbm %s1160_s23, 128  ;;  %s859_s14 = scalar_lea.hbm %s1212_s8, 256 }
 0x263   : > { %p856_p10 = scmp.ne.s32.totalorder %s1160_s23, %s855_s30  ;;  %p860_p3 = scmp.lt.u32.totalorder %s1160_s23, %s1212_s8 }
 0x264   : > { %p861_p9 = scmp.lt.u32.totalorder %s859_s14, %s855_s30  ;;  %p863_p8 = scmp.lt.u32.totalorder %s855_s30, %s1160_s23 }
 0x265   : > { %p857_p12 = pnand %p856_p10, %p1222_p0 }
 0x266   : > { %p862_p11 = por %p861_p9, %p860_p3 }
 0x267   : > { %p858_p1 = pneg %p857_p12 }
 0x268   : > { %p864_p6 = por %p863_p8, %p862_p11 }
 0x26a   : > { %p865_p13 = pnand %p864_p6, %p858_p1 }
 0x26c   : > { %868 = shalt.err (!%p865_p13)
}
 0x26d   : > { %733 = dma.vmem_to_hbm [thread:$0]  (%p1222_p0), %s579_s15, 128, %s1160_s23, %s564_s22  }
 0x26e PF: > { %s590_s24 = sand.u32 1, %s903_s27   ;;  %p1223_p2 = scmp.ne.s32.totalorder %s1218_s20, 0 }
 0x26f   : > { %p1224_p5 = scmp.ge.s32.totalorder %s923_s10, 2  ;;  %s591_s21 = scalar_lea.sflag [#allocation4], %s590_s24 }
 0x271   : > { %p740_p4 = pnand %p1224_p5, %p1223_p2 }
 0x273   : > { %898 = dma.done.wait (!%p740_p4), %s591_s21, 128  }
 0x274   : > { %900 = vsyncadd (!%p740_p4), %s591_s21, 4294967168  ;;  %s24_s10 = sadd.s32 1, %s923_s10   ;;  %s1225_s27 = smov %s907_s28 }
 0x275   : > { %p21_p7 = scmp.ge.s32.totalorder %s24_s10, 4   ;;  %s1226_s28 = smov %s911_s29 }
 0x276   : > { %s1227_s29 = smov %s1031_s19  ;;  %s1228_s30 = smov %s919_s9 }
 0x277   : > { %s1229_s9 = smov %s1231_s13  ;;  %23 = sbr.rel (!%p21_p7) target bundleno = 6 (0x6), region = 113 }
 0x27e   :  { %596 = vsyncpa [#allocation3], 1 }
 0x27f   :  { %598 = vsyncpa [#allocation3 + $0x1], 1 }
 0x280   :  { %599 = vsyncpa [#allocation4], 1 }
 0x281   :  { %601 = vsyncpa [#allocation4 + $0x1], 1 }

</bundles_post_ra>
